<compile_context>
chip_gen: v7x
topology: tpu7x:2x2x1
jax: 0.10.0
libtpu: 0.0.40
codegen_flags: <defaults>
</compile_context>

<pallas_src>
import math

import jax
import jax.numpy as jnp
from jax.experimental import pallas as pl
from jax.experimental.pallas import tpu as pltpu


_INV_SQRT2 = 0.7071067811865476


def _erf_f32(x):
    """erf via Abramowitz & Stegun 7.1.26 (max abs error ~1.5e-7)."""
    a1 = 0.254829592
    a2 = -0.284496736
    a3 = 1.421413741
    a4 = -1.453152027
    a5 = 1.061405429
    p = 0.3275911
    ax = jnp.abs(x)
    t = 1.0 / (1.0 + p * ax)
    poly = ((((a5 * t + a4) * t + a3) * t + a2) * t + a1) * t
    y = 1.0 - poly * jnp.exp(-ax * ax)
    return jnp.where(x >= 0.0, y, -y)


def _gelu_exact(x):
    # Matches torch.nn.GELU() default (approximate='none').
    return 0.5 * x * (1.0 + _erf_f32(x * _INV_SQRT2))


def _make_fan_kernel(dp: int, dg: int):
    def kernel(x_ref, wp_ref, bp_ref, wg_ref, bg_ref, o_ref):
        # x_ref: (TM, in_f)   wp_ref: (in_f, dp)   wg_ref: (in_f, dg)
        # bp_ref: (1, dp)     bg_ref: (1, dg)      o_ref: (TM, 2*dp + dg)
        x = x_ref[...]

        # Two projections on the MXU, f32 accumulation.
        p = jnp.dot(x, wp_ref[...], preferred_element_type=jnp.float32) + bp_ref[...]
        g = jnp.dot(x, wg_ref[...], preferred_element_type=jnp.float32) + bg_ref[...]

        g = _gelu_exact(g)

        # concat(cos(p), sin(p), gelu(g)) as three column-slab stores.
        o_ref[:, 0:dp] = jnp.cos(p).astype(o_ref.dtype)
        o_ref[:, dp:2 * dp] = jnp.sin(p).astype(o_ref.dtype)
        o_ref[:, 2 * dp:2 * dp + dg] = g.astype(o_ref.dtype)

    return kernel


def _round_up(x, m):
    return ((x + m - 1) // m) * m


def fan_layer(x, w_p, b_p, w_g, b_g, *, block_m: int = 512):
    """FANLayer forward.

    x:   (..., in_features)
    w_p: (in_features, dp)      b_p: (dp,)
    w_g: (in_features, dg)      b_g: (dg,)
    returns (..., 2*dp + dg)    with layout [cos(p), sin(p), gelu(g)]
    """
    *lead, in_f = x.shape
    M = int(math.prod(lead)) if lead else 1
    dp = w_p.shape[1]
    dg = w_g.shape[1]
    out_f = 2 * dp + dg

    x2d = x.reshape(M, in_f)

    # Row-tile: multiples of 8 sublanes; pad M so the grid divides evenly.
    tm = min(block_m, _round_up(M, 8))
    m_pad = _round_up(M, tm)
    if m_pad != M:
        x2d = jnp.pad(x2d, ((0, m_pad - M), (0, 0)))

    bp2 = b_p.reshape(1, dp)
    bg2 = b_g.reshape(1, dg)

    itemsize = jnp.dtype(x.dtype).itemsize
    cost = pl.CostEstimate(
        flops=2 * m_pad * in_f * (dp + dg),
        transcendentals=2 * m_pad * (dp + dg),
        bytes_accessed=(m_pad * in_f + m_pad * out_f) * itemsize
        + (in_f * (dp + dg) + dp + dg) * 4,
    )

    out2d = pl.pallas_call(
        _make_fan_kernel(dp, dg),
        out_shape=jax.ShapeDtypeStruct((m_pad, out_f), x.dtype),
        grid_spec=pltpu.PrefetchScalarGridSpec(
            num_scalar_prefetch=0,
            grid=(m_pad // tm,),
            in_specs=[
                pl.BlockSpec((tm, in_f), lambda i: (i, 0)),   # x tile (pipelined)
                pl.BlockSpec((in_f, dp), lambda i: (0, 0)),   # Wp (resident)
                pl.BlockSpec((1, dp), lambda i: (0, 0)),      # bp
                pl.BlockSpec((in_f, dg), lambda i: (0, 0)),   # Wg (resident)
                pl.BlockSpec((1, dg), lambda i: (0, 0)),      # bg
            ],
            out_specs=pl.BlockSpec((tm, out_f), lambda i: (i, 0)),
        ),
        compiler_params=pltpu.CompilerParams(
            dimension_semantics=("parallel",),
        ),
        cost_estimate=cost,
    )(x2d, w_p, bp2, w_g, bg2)

    if m_pad != M:
        out2d = out2d[:M]
    return out2d.reshape(*lead, out_f)


def reference(x, w_p, b_p, w_g, b_g):
    # Pure-JAX mirror of the PyTorch module (exact erf GELU).
    p = jnp.einsum('...i,io->...o', x, w_p,
                   precision=jax.lax.Precision.HIGHEST) + b_p
    g = jnp.einsum('...i,io->...o', x, w_g,
                   precision=jax.lax.Precision.HIGHEST) + b_g
    g = jax.nn.gelu(g, approximate=False)
    return jnp.concatenate([jnp.cos(p), jnp.sin(p), g], axis=-1)


if __name__ == "__main__":
    key = jax.random.PRNGKey(0)
    B, L = 2, 8
    input_dim, output_dim = 32, 32
    dp = output_dim // 4                     # input_linear_p out dim
    dg = output_dim - output_dim // 2        # input_linear_g out dim

    kx, kwp, kbp, kwg, kbg = jax.random.split(key, 5)

    # nn.Linear default init: U(-1/sqrt(in), 1/sqrt(in)) for weight and bias.
    bound = 1.0 / math.sqrt(input_dim)
    w_p = jax.random.uniform(kwp, (input_dim, dp), jnp.float32,
                             minval=-bound, maxval=bound)
    b_p = jax.random.uniform(kbp, (dp,), jnp.float32,
                             minval=-bound, maxval=bound)
    w_g = jax.random.uniform(kwg, (input_dim, dg), jnp.float32,
                             minval=-bound, maxval=bound)
    b_g = jax.random.uniform(kbg, (dg,), jnp.float32,
                             minval=-bound, maxval=bound)

    x = jax.random.normal(kx, (B, L, input_dim), jnp.float32)

    out = fan_layer(x, w_p, b_p, w_g, b_g)
    out = jax.block_until_ready(out)

    ref = reference(x, w_p, b_p, w_g, b_g)
    assert out.shape == (B, L, output_dim), out.shape
    max_err = float(jnp.max(jnp.abs(out - ref)))
    assert jnp.allclose(out, ref, atol=1e-3, rtol=1e-3), f"mismatch, max_err={max_err}"

    print("KERNEL_OK")
</pallas_src>

<mosaic_0001>
module attributes {stable_mosaic.version = 11 : i64} {
  func.func @kernel(%arg0: i32, %arg1: memref<16x32xf32, #tpu.memory_space<vmem>>, %arg2: memref<32x8xf32, #tpu.memory_space<vmem>>, %arg3: memref<1x8xf32, #tpu.memory_space<vmem>>, %arg4: memref<32x16xf32, #tpu.memory_space<vmem>>, %arg5: memref<1x16xf32, #tpu.memory_space<vmem>>, %arg6: memref<16x32xf32, #tpu.memory_space<vmem>>) attributes {dimension_semantics = [#tpu.dimension_semantics<parallel>], iteration_bounds = array<i64: 1>, scalar_prefetch = 0 : i64, scratch_operands = 0 : i64, tpu.core_type = #tpu.core_type<tc>, window_params = [{transform_indices = @transform_0, window_bounds = array<i64: 16, 32>}, {pipeline_mode = #tpu.pipeline_mode<synchronous>, transform_indices = @transform_1, window_bounds = array<i64: 32, 8>}, {pipeline_mode = #tpu.pipeline_mode<synchronous>, transform_indices = @transform_2, window_bounds = array<i64: 1, 8>}, {pipeline_mode = #tpu.pipeline_mode<synchronous>, transform_indices = @transform_3, window_bounds = array<i64: 32, 16>}, {pipeline_mode = #tpu.pipeline_mode<synchronous>, transform_indices = @transform_4, window_bounds = array<i64: 1, 16>}, {transform_indices = @transform_5, window_bounds = array<i64: 16, 32>}]} {
    %c0 = arith.constant 0 : index
    %c0_0 = arith.constant 0 : index
    %0 = vector.load %arg1[%c0, %c0_0] : memref<16x32xf32, #tpu.memory_space<vmem>>, vector<16x32xf32>
    %c0_1 = arith.constant 0 : index
    %c0_2 = arith.constant 0 : index
    %1 = vector.load %arg2[%c0_1, %c0_2] : memref<32x8xf32, #tpu.memory_space<vmem>>, vector<32x8xf32>
    %cst = arith.constant dense<0.000000e+00> : vector<16x8xf32>
    %2 = tpu.matmul %0, %1, %cst {dimension_numbers = #tpu.dot_dimension_numbers<[1], [0], [0], [1], [0, 0, 1, 1], [], []>} : vector<16x32xf32>, vector<32x8xf32>, vector<16x8xf32> -> vector<16x8xf32>
    %c0_3 = arith.constant 0 : index
    %c0_4 = arith.constant 0 : index
    %3 = vector.load %arg3[%c0_3, %c0_4] : memref<1x8xf32, #tpu.memory_space<vmem>>, vector<1x8xf32>
    %4 = vector.broadcast %3 : vector<1x8xf32> to vector<16x8xf32>
    %5 = arith.addf %2, %4 : vector<16x8xf32>
    %c0_5 = arith.constant 0 : index
    %c0_6 = arith.constant 0 : index
    %6 = vector.load %arg4[%c0_5, %c0_6] : memref<32x16xf32, #tpu.memory_space<vmem>>, vector<32x16xf32>
    %cst_7 = arith.constant dense<0.000000e+00> : vector<16x16xf32>
    %7 = tpu.matmul %0, %6, %cst_7 {dimension_numbers = #tpu.dot_dimension_numbers<[1], [0], [0], [1], [0, 0, 1, 1], [], []>} : vector<16x32xf32>, vector<32x16xf32>, vector<16x16xf32> -> vector<16x16xf32>
    %c0_8 = arith.constant 0 : index
    %c0_9 = arith.constant 0 : index
    %8 = vector.load %arg5[%c0_8, %c0_9] : memref<1x16xf32, #tpu.memory_space<vmem>>, vector<1x16xf32>
    %9 = vector.broadcast %8 : vector<1x16xf32> to vector<16x16xf32>
    %10 = arith.addf %7, %9 : vector<16x16xf32>
    %cst_10 = arith.constant 5.000000e-01 : f32
    %11 = vector.broadcast %cst_10 : f32 to vector<16x16xf32>
    %12 = arith.mulf %11, %10 : vector<16x16xf32>
    %cst_11 = arith.constant 0.707106769 : f32
    %13 = vector.broadcast %cst_11 : f32 to vector<16x16xf32>
    %14 = arith.mulf %10, %13 : vector<16x16xf32>
    %15 = math.absf %14 : vector<16x16xf32>
    %cst_12 = arith.constant 0.327591091 : f32
    %16 = vector.broadcast %cst_12 : f32 to vector<16x16xf32>
    %17 = arith.mulf %16, %15 : vector<16x16xf32>
    %cst_13 = arith.constant 1.000000e+00 : f32
    %18 = vector.broadcast %cst_13 : f32 to vector<16x16xf32>
    %19 = arith.addf %18, %17 : vector<16x16xf32>
    %cst_14 = arith.constant 1.000000e+00 : f32
    %20 = vector.broadcast %cst_14 : f32 to vector<16x16xf32>
    %21 = arith.divf %20, %19 : vector<16x16xf32>
    %cst_15 = arith.constant 1.06140542 : f32
    %22 = vector.broadcast %cst_15 : f32 to vector<16x16xf32>
    %23 = arith.mulf %22, %21 : vector<16x16xf32>
    %cst_16 = arith.constant -1.45315206 : f32
    %24 = vector.broadcast %cst_16 : f32 to vector<16x16xf32>
    %25 = arith.addf %23, %24 : vector<16x16xf32>
    %26 = arith.mulf %25, %21 : vector<16x16xf32>
    %cst_17 = arith.constant 1.42141378 : f32
    %27 = vector.broadcast %cst_17 : f32 to vector<16x16xf32>
    %28 = arith.addf %26, %27 : vector<16x16xf32>
    %29 = arith.mulf %28, %21 : vector<16x16xf32>
    %cst_18 = arith.constant -0.284496725 : f32
    %30 = vector.broadcast %cst_18 : f32 to vector<16x16xf32>
    %31 = arith.addf %29, %30 : vector<16x16xf32>
    %32 = arith.mulf %31, %21 : vector<16x16xf32>
    %cst_19 = arith.constant 0.254829586 : f32
    %33 = vector.broadcast %cst_19 : f32 to vector<16x16xf32>
    %34 = arith.addf %32, %33 : vector<16x16xf32>
    %35 = arith.mulf %34, %21 : vector<16x16xf32>
    %cst_20 = arith.constant 0.000000e+00 : f32
    %36 = vector.broadcast %cst_20 : f32 to vector<16x16xf32>
    %37 = arith.subf %36, %15 : vector<16x16xf32>
    %38 = arith.mulf %37, %15 : vector<16x16xf32>
    %39 = math.exp %38 : vector<16x16xf32>
    %40 = arith.mulf %35, %39 : vector<16x16xf32>
    %cst_21 = arith.constant 1.000000e+00 : f32
    %41 = vector.broadcast %cst_21 : f32 to vector<16x16xf32>
    %42 = arith.subf %41, %40 : vector<16x16xf32>
    %cst_22 = arith.constant 0.000000e+00 : f32
    %43 = vector.broadcast %cst_22 : f32 to vector<16x16xf32>
    %44 = arith.cmpf oge, %14, %43 : vector<16x16xf32>
    %cst_23 = arith.constant 0.000000e+00 : f32
    %45 = vector.broadcast %cst_23 : f32 to vector<16x16xf32>
    %46 = arith.subf %45, %42 : vector<16x16xf32>
    %47 = arith.select %44, %42, %46 : vector<16x16xi1>, vector<16x16xf32>
    %cst_24 = arith.constant 1.000000e+00 : f32
    %48 = vector.broadcast %cst_24 : f32 to vector<16x16xf32>
    %49 = arith.addf %48, %47 : vector<16x16xf32>
    %50 = arith.mulf %12, %49 : vector<16x16xf32>
    %51 = math.cos %5 : vector<16x8xf32>
    %c0_25 = arith.constant 0 : index
    %c0_26 = arith.constant 0 : index
    %52 = vector.load %arg6[%c0_25, %c0_26] : memref<16x32xf32, #tpu.memory_space<vmem>>, vector<16x8xf32>
    tpu.vector_store %arg6[%c0_25, %c0_26], %51 {strides = array<i32>} : memref<16x32xf32, #tpu.memory_space<vmem>>, vector<16x8xf32>,
    %53 = math.sin %5 : vector<16x8xf32>
    %c0_27 = arith.constant 0 : index
    %c8 = arith.constant 8 : index
    %54 = vector.load %arg6[%c0_27, %c8] : memref<16x32xf32, #tpu.memory_space<vmem>>, vector<16x8xf32>
    tpu.vector_store %arg6[%c0_27, %c8], %53 {strides = array<i32>} : memref<16x32xf32, #tpu.memory_space<vmem>>, vector<16x8xf32>,
    %c0_28 = arith.constant 0 : index
    %c16 = arith.constant 16 : index
    %55 = vector.load %arg6[%c0_28, %c16] : memref<16x32xf32, #tpu.memory_space<vmem>>, vector<16x16xf32>
    tpu.vector_store %arg6[%c0_28, %c16], %50 {strides = array<i32>} : memref<16x32xf32, #tpu.memory_space<vmem>>, vector<16x16xf32>,
    return
  }
  func.func @transform_0(%arg0: i32) -> (i32, i32) {
    %c0_i32 = arith.constant 0 : i32
    %c0_i32_0 = arith.constant 0 : i32
    return %arg0, %c0_i32 : i32, i32
  }
  func.func @transform_1(%arg0: i32) -> (i32, i32) {
    %c0_i32 = arith.constant 0 : i32
    %c0_i32_0 = arith.constant 0 : i32
    %c0_i32_1 = arith.constant 0 : i32
    return %c0_i32, %c0_i32_0 : i32, i32
  }
  func.func @transform_2(%arg0: i32) -> (i32, i32) {
    %c0_i32 = arith.constant 0 : i32
    %c0_i32_0 = arith.constant 0 : i32
    %c0_i32_1 = arith.constant 0 : i32
    return %c0_i32, %c0_i32_0 : i32, i32
  }
  func.func @transform_3(%arg0: i32) -> (i32, i32) {
    %c0_i32 = arith.constant 0 : i32
    %c0_i32_0 = arith.constant 0 : i32
    %c0_i32_1 = arith.constant 0 : i32
    return %c0_i32, %c0_i32_0 : i32, i32
  }
  func.func @transform_4(%arg0: i32) -> (i32, i32) {
    %c0_i32 = arith.constant 0 : i32
    %c0_i32_0 = arith.constant 0 : i32
    %c0_i32_1 = arith.constant 0 : i32
    return %c0_i32, %c0_i32_0 : i32, i32
  }
  func.func @transform_5(%arg0: i32) -> (i32, i32) {
    %c0_i32 = arith.constant 0 : i32
    %c0_i32_0 = arith.constant 0 : i32
    return %arg0, %c0_i32 : i32, i32
  }
}

</mosaic_0001>

<bundles_post_ra>
// kernel: tpu_custom_call.1
= control target key start
LH: loop header
LB: loop body
LE: loop exit
PB: predicated region body
PF: predicated region fallthrough
CT: control target
= control target key end

     0   :  { %vm34_vm0 = vcmask 261120   ;;  %s1111_s0 = inlined_call_operand.vmem [shape: f32[16,32], index: 0, kind: input, shape index: {}]   ;;  %s1112_s1 = inlined_call_operand.vmem [shape: f32[32,8], index: 1, kind: input, shape index: {}]   ;;  %s1113_s2 = inlined_call_operand.vmem [shape: f32[1,8], index: 2, kind: input, shape index: {}]   ;;  %s1114_s3 = inlined_call_operand.vmem [shape: f32[32,16], index: 3, kind: input, shape index: {}]   ;;  %s1115_s4 = inlined_call_operand.vmem [shape: f32[1,16], index: 4, kind: input, shape index: {}]   ;;  %s1116_s5 = inlined_call_operand.hbm [shape: f32[16,32], index: 5, kind: output, shape index: {}]  }
   0x1   :  { %v23_v0 = vld [vmem:[%s1112_s1] sm:$0xff]  ;;  %v24_v1 = vld [vmem:[%s1112_s1 + $0x8] sm:$0xff]  ;;  %v25_v5 = vld [vmem:[%s1112_s1 + $0x10] sm:$0xff] }
   0x2   :  { %v116_v2 = vld [vmem:[%s1114_s3] sm:$0xff]  ;;  %v767_v3 = vpack.c.bf16 %v24_v1, %v23_v0  ;;  %v117_v4 = vld [vmem:[%s1114_s3 + $0x8] sm:$0xff]  ;;  %v26_v6 = vld [vmem:[%s1112_s1 + $0x18] sm:$0xff] }
   0x3   :  { %v775_v7 = vpack.c.bf16 %v117_v4, %v116_v2  ;;  %v771_v8 = vpack.c.bf16 %v26_v6, %v25_v5  ;;  %v118_v9 = vld [vmem:[%s1114_s3 + $0x10] sm:$0xff]  ;;  %v119_v10 = vld [vmem:[%s1114_s3 + $0x18] sm:$0xff]  ;;  %v21_v11 = vld [vmem:[%s1111_s0] sm:$0xff] }
   0x4   :  { %768 = vmatprep.subr.bf16.mxu0 %v767_v3  ;;  %v779_v12 = vpack.c.bf16 %v119_v10, %v118_v9  ;;  %753 = vmatprep.mubr.msk.f32.mxu0 %vm34_vm0, %v21_v11 }
   0x5   :  { %10 = vsyncpa [#allocation3], 0  ;;  %776 = vmatprep.subr.bf16.mxu1 %v775_v7  ;;  %770 = vmatpush3.bf16.msra.mxu0 %v767_v3  ;;  %v22_v13 = vld [vmem:[%s1111_s0 + $0x8] sm:$0xff]  ;;  %v711_v14 = vld [vmem:[%s1113_s2] ss:$0 sm:$0xff]  ;;  %s847_s0 = smov 16  }
   0x6   :  { %778 = vmatpush3.bf16.msra.mxu1 %v775_v7  ;;  %772 = vmatprep.subr.bf16.mxu0 %v771_v8  ;;  %v714_v15 = vld [vmem:[%s1115_s4] ss:$0 sm:$0xff]  ;;  %v841_v57 = vmov 683565275   ;;  %v842_v59 = vmov 2475754826  }
   0x7   :  { %780 = vmatprep.subr.bf16.mxu1 %v779_v12  ;;  %764 = vmatprep.mubr.msk.f32.mxu1 %vm34_vm0, %v21_v11  ;;  %v843_v62 = vmov 2131351028   ;;  %v844_v0 = vmov 2102212464   ;;  %v845_v2 = vmov 920167782  }
   0x8   :  { %v846_v9 = vmov 1326507024   ;;  %s848_s2 = smov 8   ;;  %s849_s4 = smov [#allocation2]  }
   0x9   :  { %774 = vmatpush3.bf16.msra.mxu0 %v771_v8  ;;  %s700_s15 = sshll.u32 %s849_s4, 4  ;;  %s701_s15 = int_to_ptr.vmem [resolvable:$true] %s700_s15 }
   0xa   :  { %782 = vmatpush3.bf16.msra.mxu1 %v779_v12  ;;  %s817_s16 = scalar_lea.vmem %s701_s15, 256  ;;  %p822_p1 = scmp.lt.s32.totalorder %s701_s15, %s701_s15 }
   0xb   :  { %p818_p0 = scmp.ne.s32.totalorder %s701_s15, %s817_s16  ;;  %p823_p2 = scmp.lt.s32.totalorder %s817_s16, %s817_s16 }
   0xc   :  { %754 = vmatmul.mubr.msk.f32.vlgmr.msra.gmra.mrb[0].mxu0 %vm34_vm0, %v22_v13 }
   0xd   :  { %765 = vmatmul.mubr.msk.f32.vlgmr.msra.gmra.mrb[0].mxu1 %vm34_vm0, %v22_v13  ;;  %p824_p3 = por %p823_p2, %p822_p1 }
   0xf   :  { %p825_p4 = pnand %p824_p3, %p818_p0 }
  0xdf   :  { %v755_v16 = vpop.f32.mrb[0].mxu0 }
  0xe0   :  { %v921_v17 = vadd.f32 %v755_v16, %v711_v14  ;;  %v766_v18 = vpop.f32.mrb[0].mxu1  ;;  %v107_v19 = vpop.f32.mrb[1].mxu0 }
  0xe1   :  { %v923_v20 = vadd.f32 %v766_v18, %v714_v15  ;;  %v925_v21 = vadd.f32 %v711_v14, %v107_v19  ;;  %v193_v22 = vpop.f32.mrb[1].mxu1 }
  0xe2   :  { %v359_v23 = vand.u32 2147483647, %v921_v17  ;;  %v362_v24 = vand.u32 2139095040, %v921_v17  ;;  %v929_v25 = vadd.f32 %v714_v15, %v193_v22  ;;  %vm361_vm0 = vcmp.lt.s32.totalorder %v921_v17, 0 }
  0xe3   :  { %v932_v26 = vmul.f32 0.70710677, %v923_v20  ;;  %v259_v27 = vand.u32 2139095040, %v925_v21  ;;  %v256_v49 = vand.u32 2147483647, %v925_v21 }
  0xe4   :  { %v363_v28 = vshrl.u32 %v362_v24, 23  ;;  %v366_v29 = vand.u32 8388607, %v359_v23  ;;  %v938_v30 = vmul.f32 0.70710677, %v929_v25 }
  0xe5   :  { %v207_v31 = vand.u32 2147483647, %v932_v26  ;;  %v260_v32 = vshrl.u32 %v259_v27, 23  ;;  %vm247_vm15 = vcmp.ge.f32.partialorder %v932_v26, 0.0 }
  0xe6   :  { %v721_v33 = vadd.s32 4294967169, %v363_v28  ;;  %v206_v34 = vand.u32 2147483647, %v938_v30  ;;  %v367_v35 = vor.u32 8388608, %v366_v29  ;;  %vm246_vm13 = vcmp.ge.f32.partialorder %v938_v30, 0.0 }
  0xe7   :  { %v209_v36 = vmul.f32 0.3275911, %v207_v31  ;;  %v235_v37 = vsub.f32 0.0, %v207_v31  ;;  %v717_v38 = vadd.s32 4294967169, %v260_v32 }
  0xe8   :  { %v369_v39 = vadd.s32 1, %v721_v33  ;;  %v208_v40 = vmul.f32 0.3275911, %v206_v34  ;;  %v234_v41 = vsub.f32 0.0, %v206_v34  ;;  %v942_v48 = vshll.u32 %v367_v35, 8 }
  0xe9   :  { %v211_v42 = vadd.f32 1.0, %v209_v36  ;;  %v237_v43 = vmul.f32 %v235_v37, %v207_v31  ;;  %v266_v44 = vadd.s32 1, %v717_v38 }
  0xea   :  { %vm370_vm1 = vcmp.gt.s32.totalorder %v369_v39, 0  ;;  %v210_v45 = vadd.f32 1.0, %v208_v40  ;;  %v236_v46 = vmul.f32 %v234_v41, %v206_v34 }
  0xeb   :  { %v371_v47 = vsel %vm370_vm1, %v369_v39, 0  ;;  %vm267_vm2 = vcmp.gt.s32.totalorder %v266_v44, 0  ;;  %v240_v53 = vmul.f32 1.442695, %v237_v43 }
  0xec   :  { %v372_v50 = vshrl.u32 %v371_v47, 5  ;;  %v373_v51 = vand.u32 31, %v371_v47  ;;  %v268_v52 = vsel %vm267_vm2, %v266_v44, 0  ;;  %801 = vrcp.f32 %v210_v45 }
  0xed   :  { %803 = vrcp.f32 %v211_v42  ;;  %v945_v54 = vshrl.u32 %v268_v52, 5  ;;  %v947_v55 = vand.u32 31, %v268_v52  ;;  %v238_v61 = vmul.f32 1.442695, %v236_v46 }
  0xee   :  { %v374_v56 = vsub.s32 32, %v373_v51  ;;  %v376_v58 = vshll.u32 %v841_v57, %v373_v51  ;;  %v379_v60 = vshll.u32 %v842_v59, %v373_v51  ;;  %v382_v63 = vshll.u32 %v843_v62, %v373_v51 }
  0xef   :  { %v385_v1 = vshll.u32 %v844_v0, %v373_v51  ;;  %v388_v3 = vshll.u32 %v845_v2, %v373_v51  ;;  %vm391_vm3 = vcmp.lt.s32.totalorder %v372_v50, 1  ;;  %vm392_vm4 = vcmp.lt.s32.totalorder %v372_v50, 2 }
  0xf0   :  { %v377_v4 = vshrl.u32 %v842_v59, %v374_v56  ;;  %v380_v5 = vshrl.u32 %v843_v62, %v374_v56  ;;  %v383_v6 = vshrl.u32 %v844_v0, %v374_v56  ;;  %v375_v7 = vshrl.u32 %v841_v57, %v374_v56 }
  0xf1   :  { %v386_v8 = vshrl.u32 %v845_v2, %v374_v56  ;;  %v389_v10 = vshrl.u32 %v846_v9, %v374_v56  ;;  %vm393_vm5 = vcmp.lt.s32.totalorder %v372_v50, 3  ;;  %v958_v14 = vsub.s32 32, %v947_v55 }
  0xf2   :  { %v378_v11 = vor.u32 %v377_v4, %v376_v58  ;;  %v381_v12 = vor.u32 %v380_v5, %v379_v60  ;;  %v384_v13 = vor.u32 %v383_v6, %v382_v63  ;;  %vm394_vm6 = vcmp.lt.s32.totalorder %v372_v50, 4 }
  0xf3   :  { %v387_v15 = vor.u32 %v386_v8, %v385_v1  ;;  %v390_v16 = vor.u32 %v389_v10, %v388_v3  ;;  %v282_v18 = vshll.u32 %v844_v0, %v947_v55  ;;  %v283_v32 = vshrl.u32 %v845_v2, %v958_v14 }
  0xf4   :  { %v395_v19 = vsel %vm391_vm3, %v375_v7, %v378_v11  ;;  %v396_v22 = vsel %vm394_vm6, %v384_v13, 2102212464  ;;  %v399_v24 = vsel %vm391_vm3, %v378_v11, %v381_v12  ;;  %v403_v27 = vsel %vm391_vm3, %v381_v12, %v384_v13 }
  0xf5   :  { %v397_v28 = vsel %vm393_vm5, %v381_v12, %v396_v22  ;;  %v400_v29 = vsel %vm394_vm6, %v387_v15, 920167782  ;;  %v404_v31 = vsel %vm394_vm6, %v390_v16, 1326507024  ;;  %v285_v36 = vshll.u32 %v845_v2, %v947_v55 }
  0xf6   :  { %v967_v33 = vpop.eup %801  ;;  %v401_v34 = vsel %vm393_vm5, %v384_v13, %v400_v29  ;;  %v405_v35 = vsel %vm393_vm5, %v387_v15, %v404_v31  ;;  %v286_v37 = vshrl.u32 %v846_v9, %v958_v14  ;;  %v398_v39 = vsel %vm392_vm4, %v395_v19, %v397_v28 }
  0xf7   :  { %v973_v38 = vpop.eup %803  ;;  %v402_v40 = vsel %vm392_vm4, %v399_v24, %v401_v34  ;;  %v406_v41 = vsel %vm392_vm4, %v403_v27, %v405_v35  ;;  %v284_v42 = vor.u32 %v283_v32, %v282_v18  ;;  %805 = vpow2.f32 %v240_v53 }
  0xf8   :  { %v979_v43 = vmul.u32.u64.low %v942_v48, %v406_v41  ;;  %v980_v44 = vmul.u32.u64.high %v942_v48, %v406_v41, %v979_v43  ;;  %v983_v45 = vmul.u32.u64.low %v942_v48, %v402_v40  ;;  %v984_v46 = vmul.u32.u64.high %v942_v48, %v402_v40, %v983_v45 }
  0xf9   :  { %v216_v47 = vmul.f32 1.0614054, %v967_v33  ;;  %v263_v51 = vand.u32 8388607, %v256_v49  ;;  %v414_v52 = vmul.u32 %v942_v48, %v398_v39  ;;  %v287_v50 = vor.u32 %v286_v37, %v285_v36 }
  0xfa   :  { %vm291_vm7 = vcmp.lt.s32.totalorder %v945_v54, 4  ;;  %v217_v56 = vmul.f32 1.0614054, %v973_v38  ;;  %807 = vpow2.f32 %v238_v61  ;;  %v273_v60 = vshll.u32 %v841_v57, %v947_v55 }
  0xfb   :  { %v218_v58 = vadd.f32 -1.4531521, %v216_v47  ;;  %v274_v53 = vshrl.u32 %v842_v59, %v958_v14  ;;  %vm416_vm8 = vc.u32 %v980_v44, %v983_v45  ;;  %v417_v63 = vadd.s32 1, %v984_v46 }
  0xfc   :  { %v297_v48 = vsel %vm291_vm7, %v284_v42, 920167782  ;;  %v219_v1 = vadd.f32 -1.4531521, %v217_v56  ;;  %v276_v61 = vshll.u32 %v842_v59, %v947_v55  ;;  %v277_v4 = vshrl.u32 %v843_v62, %v958_v14 }
  0xfd   :  { %v220_v2 = vmul.f32 %v967_v33, %v218_v58  ;;  %v275_v3 = vor.u32 %v274_v53, %v273_v60  ;;  %v418_v5 = vsel %vm416_vm8, %v417_v63, %v984_v46  ;;  %v279_v7 = vshll.u32 %v843_v62, %v947_v55 }
  0xfe   :  { %v221_v6 = vmul.f32 %v973_v38, %v219_v1  ;;  %v280_v8 = vshrl.u32 %v844_v0, %v958_v14  ;;  %v419_v9 = vadd.s32 %v418_v5, %v414_v52  ;;  %v264_v11 = vor.u32 8388608, %v263_v51 }
  0xff   :  { %v222_v10 = vadd.f32 1.4214138, %v220_v2  ;;  %v278_v12 = vor.u32 %v277_v4, %v276_v61  ;;  %v301_v59 = vsel %vm291_vm7, %v287_v50, 1326507024  ;;  %vm288_vm9 = vcmp.lt.s32.totalorder %v945_v54, 1 }
 0x100   :  { %v223_v13 = vadd.f32 1.4214138, %v221_v6  ;;  %v281_v15 = vor.u32 %v280_v8, %v279_v7  ;;  %v420_v16 = vadd.s32 536870912, %v419_v9  ;;  %vm290_vm10 = vcmp.lt.s32.totalorder %v945_v54, 3 }
 0x101   :  { %v224_v18 = vmul.f32 %v967_v33, %v222_v10  ;;  %v296_v55 = vsel %vm288_vm9, %v275_v3, %v278_v12  ;;  %v272_v0 = vshrl.u32 %v841_v57, %v958_v14  ;;  %v806_v24 = vpop.eup %805  ;;  %vm289_vm11 = vcmp.lt.s32.totalorder %v945_v54, 2 }
 0x102   :  { %v225_v62 = vmul.f32 %v973_v38, %v223_v13  ;;  %v298_v19 = vsel %vm290_vm10, %v281_v15, %v297_v48  ;;  %v300_v22 = vsel %vm288_vm9, %v278_v12, %v281_v15  ;;  %v1027_v27 = vshrl.u32 %v420_v16, 30 }
 0x103   :  { %v226_v28 = vadd.f32 -0.28449672, %v224_v18  ;;  %v293_v29 = vsel %vm291_vm7, %v281_v15, 2102212464  ;;  %v299_v32 = vsel %vm289_vm11, %v296_v55, %v298_v19  ;;  %v302_v57 = vsel %vm290_vm10, %v284_v42, %v301_v59 }
 0x104   :  { %v227_v31 = vadd.f32 -0.28449672, %v225_v62  ;;  %v304_v14 = vshll.u32 %v264_v11, 8  ;;  %v808_v34 = vpop.eup %807  ;;  %v422_v35 = vshll.u32 %v1027_v27, 30  ;;  %v292_v37 = vsel %vm288_vm9, %v272_v0, %v275_v3 }
 0x105   :  { %v228_v36 = vmul.f32 %v967_v33, %v226_v28  ;;  %v303_v39 = vsel %vm289_vm11, %v300_v22, %v302_v57  ;;  %v294_v41 = vsel %vm290_vm10, %v278_v12, %v293_v29  ;;  %v415_v15 = vadd.s32 %v983_v45, %v980_v44 }
 0x106   :  { %v229_v40 = vmul.f32 %v973_v38, %v227_v31  ;;  %v1045_v43 = vmul.u32.u64.low %v304_v14, %v303_v39  ;;  %v1046_v46 = vmul.u32.u64.high %v304_v14, %v303_v39, %v1045_v43  ;;  %v423_v42 = vsub.s32 %v419_v9, %v422_v35 }
 0x107   :  { %v230_v47 = vadd.f32 0.2548296, %v228_v36  ;;  %v1048_v51 = vmul.u32.u64.low %v304_v14, %v299_v32  ;;  %v1049_v52 = vmul.u32.u64.high %v304_v14, %v299_v32, %v1048_v51  ;;  %v295_v60 = vsel %vm289_vm11, %v292_v37, %v294_v41 }
 0x108   :  { %v231_v50 = vadd.f32 0.2548296, %v229_v40  ;;  %v425_v56 = vsub.s32 0, %v423_v42  ;;  %v311_v3 = vmul.u32 %v304_v14, %v295_v60  ;;  %v202_v9 = vmul.f32 0.5, %v929_v25 }
 0x109   :  { %v232_v58 = vmul.f32 %v967_v33, %v230_v47  ;;  %vm313_vm12 = vc.u32 %v1046_v46, %v1048_v51  ;;  %v314_v1 = vadd.s32 1, %v1049_v52  ;;  %v203_v25 = vmul.f32 0.5, %v923_v20 }
 0x10a   :  { %v233_v53 = vmul.f32 %v973_v38, %v231_v50  ;;  %v722_v63 = vmin.u32 %v425_v56, %v423_v42  ;;  %vm360_vm2 = vcmp.le.f32.partialorder %v359_v23, 0.7853982  ;;  %v312_v41 = vadd.s32 %v1048_v51, %v1046_v46 }
 0x10b   :  { %v242_v48 = vmul.f32 %v808_v34, %v232_v58  ;;  %v315_v5 = vsel %vm313_vm12, %v314_v1, %v1049_v52  ;;  %v445_v34 = vsub.s32 4, %v1027_v27  ;;  %vm1080_vm3 = vcmp.le.f32.partialorder %v256_v49, 0.7853982 }
 0x10c   :  { %v243_v2 = vmul.f32 %v806_v24, %v233_v53  ;;  %v427_v61 = vclz %v722_v63  ;;  %v316_v33 = vadd.s32 %v315_v5, %v311_v3  ;;  %vm258_vm4 = vcmp.lt.s32.totalorder %v925_v21, 0 }
 0x10d   :  { %v244_v4 = vsub.f32 1.0, %v242_v48  ;;  %v446_v37 = vsel %vm361_vm0, %v445_v34, %v1027_v27  ;;  %vm462_vm5 = vcmask 64512   ;;  %vm451_vm12 = vweird.f32 %v921_v17 }
 0x10e   :  { %v245_v6 = vsub.f32 1.0, %v243_v2  ;;  %v723_v7 = vadd.s32 4294967294, %v427_v61  ;;  %v317_v8 = vadd.s32 536870912, %v316_v33  ;;  %v448_v52 = vsel %vm360_vm2, 0, %v446_v37 }
 0x10f   :  { %v248_v54 = vsub.f32 0.0, %v244_v4  ;;  %v662_v53 = vadd.s32 3, %v448_v52  ;;  %v452_v23 = vand.u32 3, %v448_v52 }
 0x110   :  { %v249_v38 = vsub.f32 0.0, %v245_v6  ;;  %vm724_vm14 = vcmp.lt.s32.totalorder %v723_v7, 0  ;;  %v1063_v13 = vshrl.u32 %v317_v8, 30 }
 0x111   :  { %v250_v10 = vsel %vm246_vm13, %v244_v4, %v248_v54  ;;  %v430_v11 = vsel %vm724_vm14, 0, %v723_v7  ;;  %v663_v2 = vand.u32 3, %v662_v53  ;;  %vm453_vm6 = vcmp.lt.s32.totalorder %v452_v23, 2 }
 0x112   :  { %v252_v12 = vadd.f32 1.0, %v250_v10  ;;  %v251_v59 = vsel %vm247_vm15, %v245_v6, %v249_v38  ;;  %v431_v16 = vsub.s32 32, %v430_v11  ;;  %v435_v18 = vsub.s32 4294967266, %v430_v11 }
 0x113   :  { %v253_v30 = vadd.f32 1.0, %v251_v59  ;;  %v319_v62 = vshll.u32 %v1063_v13, 30  ;;  %v432_v0 = vshll.u32 %v423_v42, %v430_v11  ;;  %v342_v46 = vsub.s32 4, %v1063_v13 }
 0x114   :  { %v254_v55 = vmul.f32 %v252_v12, %v202_v9  ;;  %v433_v19 = vshrl.u32 %v415_v15, %v431_v16  ;;  %v436_v26 = vadd.s32 127, %v435_v18  ;;  %vm454_vm7 = vcmp.eq.s32.totalorder %v452_v23, 0 }
 0x115   :  { %v320_v22 = vsub.s32 %v316_v33, %v319_v62  ;;  %v255_v29 = vmul.f32 %v253_v30, %v203_v25  ;;  %vm457_vm8 = vcmp.eq.s32.totalorder %v452_v23, 2  ;;  %vm665_vm9 = vcmp.eq.s32.totalorder %v663_v2, 0 }
 0x116   :  { %686 = vrot.lane.b32.xlu1 %v254_v55, %s847_s0  ;;  %v434_v24 = vor.u32 %v433_v19, %v432_v0  ;;  %v437_v28 = vshll.u32 %v436_v26, 23  ;;  %vm668_vm10 = vcmp.eq.s32.totalorder %v663_v2, 2  ;;  %v343_v54 = vsel %vm258_vm4, %v342_v46, %v1063_v13 }
 0x117   :  { %v322_v31 = vsub.s32 0, %v320_v22  ;;  %vm664_vm11 = vcmp.lt.s32.totalorder %v663_v2, 2  ;;  %v345_v59 = vsel %vm1080_vm3, 0, %v343_v54 }
 0x118   :  { %v438_v32 = vor.u32 4788187, %v437_v28  ;;  %v441_v57 = vcvt.s32.f32 %v434_v24  ;;  %v558_v16 = vadd.s32 3, %v345_v59  ;;  %v349_v18 = vand.u32 3, %v345_v59 }
 0x119   :  { %v718_v44 = vmin.u32 %v322_v31, %v320_v22 }
 0x11a   :  { %688 = vrot.lane.b32.xlu1 %v255_v29, %s847_s0  ;;  %v439_v45 = vand.u32 2147483647, %v438_v32  ;;  %v559_v55 = vand.u32 3, %v558_v16  ;;  %vm354_vm13 = vcmp.eq.s32.totalorder %v349_v18, 2  ;;  %vm351_vm15 = vcmp.eq.s32.totalorder %v349_v18, 0 }
 0x11b   :  { %v324_v14 = vclz %v718_v44 }
 0x11c   :  { %v442_v35 = vmul.f32 %v441_v57, %v439_v45  ;;  %vm564_vm14 = vcmp.eq.s32.totalorder %v559_v55, 2 }
 0x11d   :  { %v719_v36 = vadd.s32 4294967294, %v324_v14 }
 0x11e   :  { %v443_v20 = vxor.u32 2147483648, %v442_v35 }
 0x11f   :  { %vm720_vm1 = vcmp.lt.s32.totalorder %v719_v36, 0 }
 0x120   :  { %v444_v39 = vsel %vm361_vm0, %v443_v20, %v442_v35  ;;  %v327_v40 = vsel %vm720_vm1, 0, %v719_v36  ;;  %vm561_vm0 = vcmp.eq.s32.totalorder %v559_v55, 0  ;;  %vm350_vm1 = vcmp.lt.s32.totalorder %v349_v18, 2 }
 0x121   :  { %v328_v43 = vsub.s32 32, %v327_v40  ;;  %v332_v42 = vsub.s32 4294967266, %v327_v40  ;;  %v447_v47 = vsel %vm360_vm2, %v921_v17, %v444_v39  ;;  %v329_v50 = vshll.u32 %v320_v22, %v327_v40 }
 0x122   :  { %809 = vcosq.f32 %v447_v47  ;;  %vm560_vm2 = vcmp.lt.s32.totalorder %v559_v55, 2 }
 0x123   :  { %v330_v56 = vshrl.u32 %v312_v41, %v328_v43  ;;  %v333_v58 = vadd.s32 127, %v332_v42  ;;  %811 = vsinq.f32 %v447_v47 }
 0x125   :  { %v331_v60 = vor.u32 %v330_v56, %v329_v50  ;;  %v334_v27 = vshll.u32 %v333_v58, 23 }
 0x127   :  { %v335_v63 = vor.u32 4788187, %v334_v27  ;;  %v338_v1 = vcvt.s32.f32 %v331_v60 }
 0x129   :  { %v336_v48 = vand.u32 2147483647, %v335_v63 }
 0x12b   :  { %v339_v3 = vmul.f32 %v338_v1, %v336_v48 }
 0x12c   :  { %v810_v51 = vpop.eup %809 }
 0x12d   :  { %v812_v4 = vpop.eup %811  ;;  %v340_v5 = vxor.u32 2147483648, %v339_v3  ;;  %v458_v6 = vxor.u32 2147483648, %v810_v51 }
 0x12e   :  { %v455_v33 = vxor.u32 2147483648, %v812_v4 }
 0x12f   :  { %v341_v7 = vsel %vm258_vm4, %v340_v5, %v339_v3  ;;  %v459_v38 = vsel %vm457_vm8, %v458_v6, %v812_v4  ;;  %v670_v49 = vsel %vm668_vm10, %v458_v6, %v812_v4  ;;  %vm681_vm4 = vcmask 130112  }
 0x130   :  { %v344_v8 = vsel %vm1080_vm3, %v925_v21, %v341_v7  ;;  %v456_v9 = vsel %vm454_vm7, %v810_v51, %v455_v33  ;;  %v667_v10 = vsel %vm665_vm9, %v810_v51, %v455_v33  ;;  %vm348_vm3 = vweird.f32 %v925_v21 }
 0x131   :  { %813 = vcosq.f32 %v344_v8  ;;  %v460_v11 = vsel %vm453_vm6, %v456_v9, %v459_v38  ;;  %v671_v12 = vsel %vm664_vm11, %v667_v10, %v670_v49  ;;  %vm692_vm6 = vcmask 261248  }
 0x132   :  { %815 = vsinq.f32 %v344_v8  ;;  %v461_v13 = vsel %vm451_vm12, nan, %v460_v11  ;;  %v672_v15 = vsel %vm451_vm12, nan, %v671_v12 }
 0x133   :  { %464 = vst.msk [vmem:[#allocation2 + $0x8] sm:$0xff] %vm462_vm5, %v461_v13 }
 0x13b   :  { %v814_v30 = vpop.eup %813 }
 0x13c   :  { %v816_v62 = vpop.eup %815  ;;  %v355_v0 = vxor.u32 2147483648, %v814_v30 }
 0x13d   :  { %v352_v19 = vxor.u32 2147483648, %v816_v62 }
 0x13e   :  { %v566_v17 = vsel %vm564_vm14, %v355_v0, %v816_v62  ;;  %v356_v26 = vsel %vm354_vm13, %v355_v0, %v816_v62 }
 0x13f   :  { %v563_v25 = vsel %vm561_vm0, %v814_v30, %v352_v19  ;;  %v353_v22 = vsel %vm351_vm15, %v814_v30, %v352_v19 }
 0x140   :  { %v567_v24 = vsel %vm560_vm2, %v563_v25, %v566_v17  ;;  %v357_v28 = vsel %vm350_vm1, %v353_v22, %v356_v26 }
 0x141   :  { %v568_v29 = vsel %vm348_vm3, nan, %v567_v24  ;;  %v358_v31 = vsel %vm348_vm3, nan, %v357_v28 }
 0x142   :  { %675 = vrot.lane.b32.xlu0 %v568_v29, %s848_s2  ;;  %463 = vst.msk [vmem:[#allocation2] sm:$0xff] %vm462_vm5, %v358_v31 }
 0x146   :  { %677 = vrot.lane.b32.xlu0 %v672_v15, %s848_s2 }
 0x188   :  { %v687_v32 = vpop.permute.xlu1 %686 }
 0x18c   :  { %v689_v45 = vpop.permute.xlu1 %688 }
 0x1b4   :  { %v676_v44 = vpop.permute.xlu0 %675 }
 0x1b5   :  { %682 = vst.msk [vmem:[#allocation2] sm:$0xff] %vm681_vm4, %v676_v44 }
 0x1b6   :  { %693 = vst.msk [vmem:[#allocation2] sm:$0xff] %vm692_vm6, %v687_v32 }
 0x1b8   :  { %v678_v21 = vpop.permute.xlu0 %677 }
 0x1b9   :  { %683 = vst.msk [vmem:[#allocation2 + $0x8] sm:$0xff] %vm681_vm4, %v678_v21 }
 0x1ba   :  { %694 = vst.msk [vmem:[#allocation2 + $0x8] sm:$0xff] %vm692_vm6, %v689_v45 }
 0x1bb   :  { %828 = shalt.err (!%p825_p4)
}
 0x1bc   :  { %s829_s19 = scalar_lea.hbm %s1116_s5, 256 }
 0x1bd   :  { %p830_p5 = scmp.ne.s32.totalorder %s1116_s5, %s829_s19  ;;  %p833_p6 = scmp.lt.u32.totalorder %s829_s19, %s1116_s5 }
 0x1bf   :  { %p835_p7 = pnand %p833_p6, %p830_p5 }
 0x1c1   :  { %838 = shalt.err (!%p835_p7)
}
 0x1c2   :  { %s850_s24 = smov 128  }
 0x1c3   :  { %706 = dma.vmem_to_hbm [thread:$0]  %s701_s15, 256, %s1116_s5, [#allocation3], %s850_s24, %s850_s24, %s848_s2  }
 0x1c4   :  { %839 = dma.done.wait [#allocation3], 256  }
 0x1c5   :  { %840 = vsyncadd [#allocation3], 4294967040 }
 0x1c6   :  { %710 = vsyncpa [#allocation3], 1 }

</bundles_post_ra>
